<compile_context>
chip_gen: v7x
topology: tpu7x:2x2x1
jax: 0.10.0
libtpu: 0.0.40
codegen_flags: <defaults>
</compile_context>

<pallas_src>
import functools

import jax
import jax.numpy as jnp
from jax.experimental import pallas as pl
from jax.experimental.pallas import tpu as pltpu


def _binconv3d_kernel(scale_ref, w_ref, p_ref, o_ref):
    """scale_ref: (1,1) f32 in SMEM; w_ref: (8, K) bf16 (+/-1 in row 0, zeros elsewhere);
    p_ref: (K, TILE_M) bf16 patch tile; o_ref: (8, TILE_M) f32 (row 0 is the conv output)."""
    acc = jnp.dot(w_ref[...], p_ref[...], preferred_element_type=jnp.float32)
    o_ref[...] = acc * scale_ref[0, 0]


def _pick_tile_m(m):
    # Largest candidate that divides M exactly; otherwise fall back (ragged last tile is
    # handled by Pallas output masking). All candidates are multiples of 128 (lane-dense).
    for t in (2048, 1024, 512, 256, 128):
        if m % t == 0:
            return t
    return min(m, 512)


@functools.partial(jax.jit, static_argnums=(2, 3, 4, 5, 6))
def hard_binary_conv3d(x, weights_flat, in_chn, out_chn,
                       kernel_size=3, stride=1, padding=1):
    """x: (N, out_chn, D, H, W) — the conv3d input-channel count equals `out_chn` because the
    PyTorch module views its weights as (1, out_chn, in_chn, k, k).
    weights_flat: (in_chn*out_chn*k*k, 1).  Returns (N, 1, Dout, Hout, Wout) float32."""
    n, cc, d, h, w = x.shape
    assert cc == out_chn, (cc, out_chn)
    k = kernel_size
    kd_ext = in_chn                      # conv3d kernel depth
    p, s = padding, stride

    d_out = (d + 2 * p - kd_ext) // s + 1
    h_out = (h + 2 * p - k) // s + 1
    w_out = (w + 2 * p - k) // s + 1
    m = n * d_out * h_out * w_out
    kdim = out_chn * in_chn * k * k

    # ---- weights: binarize ONCE in the wrapper (hoisted out of the per-tile body) ----
    w4 = weights_flat.reshape(out_chn, in_chn, k, k).astype(jnp.float32)   # [c, kd, kh, kw]
    scale = jnp.mean(jnp.abs(w4)).reshape(1, 1)                            # single global scalar
    sign_w = jnp.sign(w4)                                                  # {-1, 0, +1}: exact in bf16
    # reorder to the patch K ordering (kd, kh, kw, c); pad sublanes to 8 with zero rows
    sign_flat = jnp.transpose(sign_w, (1, 2, 3, 0)).reshape(1, kdim)
    w_bin8 = jnp.concatenate([sign_flat, jnp.zeros((7, kdim), jnp.float32)], axis=0)
    w_bin8 = w_bin8.astype(jnp.bfloat16)

    # ---- im2col, built directly transposed so output positions M land on the lane axis ----
    x_cn = jnp.transpose(x, (1, 0, 2, 3, 4)).astype(jnp.float32)           # (C, N, D, H, W)
    xp = jnp.pad(x_cn, ((0, 0), (0, 0), (p, p), (p, p), (p, p)))
    slabs = []
    for kd in range(kd_ext):
        for kh in range(k):
            for kw in range(k):
                slabs.append(
                    xp[:, :,
                       kd: kd + s * (d_out - 1) + 1: s,
                       kh: kh + s * (h_out - 1) + 1: s,
                       kw: kw + s * (w_out - 1) + 1: s])                   # (C, N, Do, Ho, Wo)
    patches_t = jnp.stack(slabs, axis=0)                                   # (T, C, N, Do, Ho, Wo)
    patches_t = patches_t.reshape(kdim, m).astype(jnp.bfloat16)            # K=(kd,kh,kw,c), M=(n,do,ho,wo)

    tile_m = _pick_tile_m(m)
    grid_m = pl.cdiv(m, tile_m)

    out2d = pl.pallas_call(
        _binconv3d_kernel,
        out_shape=jax.ShapeDtypeStruct((8, m), jnp.float32),
        grid=(grid_m,),
        in_specs=[
            pl.BlockSpec(memory_space=pltpu.MemorySpace.SMEM),     # scale: (1,1) scalar in SMEM
            pl.BlockSpec((8, kdim), lambda i: (0, 0)),             # binarized weights: resident
            pl.BlockSpec((kdim, tile_m), lambda i: (0, i)),        # patch tiles: streamed, double-buffered
        ],
        out_specs=pl.BlockSpec((8, tile_m), lambda i: (0, i)),     # lane-dense output tile
        compiler_params=pltpu.CompilerParams(
            dimension_semantics=("parallel",),                     # v7x: shard M tiles over both TCs
            vmem_limit_bytes=32 * 1024 * 1024),
    )(scale, w_bin8, patches_t)

    y = out2d[0].reshape(n, d_out, h_out, w_out)
    return y[:, None, :, :, :]                                     # (N, 1, Dout, Hout, Wout)


def _reference(x, weights_flat, in_chn, out_chn, kernel_size, stride, padding):
    w5 = weights_flat.reshape(1, out_chn, in_chn, kernel_size, kernel_size).astype(jnp.float32)
    scale = jnp.mean(jnp.abs(w5))
    wb = scale * jnp.sign(w5)
    return jax.lax.conv_general_dilated(
        x.astype(jnp.float32), wb,
        window_strides=(stride,) * 3,
        padding=[(padding, padding)] * 3,
        dimension_numbers=("NCDHW", "OIDHW", "NCDHW"))


if __name__ == "__main__":
    key = jax.random.PRNGKey(0)
    kx, kw_key = jax.random.split(key)

    IN_CHN, OUT_CHN, KSIZE, STRIDE, PAD = 4, 8, 3, 1, 1
    N, D, H, W = 2, 16, 16, 16

    # F.conv3d(x, W) with W viewed as (1, out_chn, in_chn, k, k) means x's channel dim must
    # equal out_chn and the kernel depth is in_chn.
    x = jax.random.normal(kx, (N, OUT_CHN, D, H, W), dtype=jnp.float32)
    num_weights = IN_CHN * OUT_CHN * KSIZE * KSIZE
    # nn.Parameter(torch.rand((num_weights, 1)) * 0.001) -> uniform [0, 0.001)
    weights = jax.random.uniform(kw_key, (num_weights, 1), dtype=jnp.float32) * 0.001

    y = hard_binary_conv3d(x, weights, IN_CHN, OUT_CHN, KSIZE, STRIDE, PAD)
    y = jax.block_until_ready(y)

    y_ref = _reference(x, weights, IN_CHN, OUT_CHN, KSIZE, STRIDE, PAD)
    d_out = (D + 2 * PAD - IN_CHN) // STRIDE + 1
    assert y.shape == (N, 1, d_out, H, W), y.shape
    # bf16 activations on the MXU (f32 accumulation): tolerance loosened vs the f32 reference.
    max_err = float(jnp.max(jnp.abs(y - y_ref)))
    assert jnp.allclose(y, y_ref, atol=5e-4, rtol=2e-2), max_err
    print("KERNEL_OK")
</pallas_src>

<mosaic_0001>
module attributes {stable_mosaic.version = 11 : i64} {
  func.func @_binconv3d_kernel(%arg0: i32, %arg1: memref<1x1xf32, #tpu.memory_space<smem>>, %arg2: memref<8x288xbf16, #tpu.memory_space<vmem>>, %arg3: memref<288x512xbf16, #tpu.memory_space<vmem>>, %arg4: memref<8x512xf32, #tpu.memory_space<vmem>>) attributes {dimension_semantics = [#tpu.dimension_semantics<parallel>], iteration_bounds = array<i64: 15>, scalar_prefetch = 0 : i64, scratch_operands = 0 : i64, tpu.core_type = #tpu.core_type<tc>, window_params = [{transform_indices = @transform_0, window_bounds = array<i64: 1, 1>}, {pipeline_mode = #tpu.pipeline_mode<synchronous>, transform_indices = @transform_1, window_bounds = array<i64: 8, 288>}, {transform_indices = @transform_2, window_bounds = array<i64: 288, 512>}, {transform_indices = @transform_3, window_bounds = array<i64: 8, 512>}]} {
    %c0 = arith.constant 0 : index
    %c0_0 = arith.constant 0 : index
    %0 = vector.load %arg2[%c0, %c0_0] : memref<8x288xbf16, #tpu.memory_space<vmem>>, vector<8x288xbf16>
    %c0_1 = arith.constant 0 : index
    %c0_2 = arith.constant 0 : index
    %1 = vector.load %arg3[%c0_1, %c0_2] : memref<288x512xbf16, #tpu.memory_space<vmem>>, vector<288x512xbf16>
    %cst = arith.constant dense<0.000000e+00> : vector<8x512xf32>
    %2 = tpu.matmul %0, %1, %cst {dimension_numbers = #tpu.dot_dimension_numbers<[1], [0], [0], [1], [0, 0, 1, 1], [], []>} : vector<8x288xbf16>, vector<288x512xbf16>, vector<8x512xf32> -> vector<8x512xf32>
    %c0_3 = arith.constant 0 : index
    %c0_4 = arith.constant 0 : index
    %3 = memref.load %arg1[%c0_3, %c0_4] : memref<1x1xf32, #tpu.memory_space<smem>>
    %4 = vector.broadcast %3 : f32 to vector<8x512xf32>
    %5 = arith.mulf %2, %4 : vector<8x512xf32>
    %c0_5 = arith.constant 0 : index
    %c0_6 = arith.constant 0 : index
    %6 = vector.load %arg4[%c0_5, %c0_6] : memref<8x512xf32, #tpu.memory_space<vmem>>, vector<8x512xf32>
    tpu.vector_store %arg4[%c0_5, %c0_6], %5 {strides = array<i32>} : memref<8x512xf32, #tpu.memory_space<vmem>>, vector<8x512xf32>,
    return
  }
  func.func @transform_0(%arg0: i32) -> (i32, i32) {
    %c0_i32 = arith.constant 0 : i32
    %c0_i32_0 = arith.constant 0 : i32
    %c0_i32_1 = arith.constant 0 : i32
    return %c0_i32, %c0_i32_0 : i32, i32
  }
  func.func @transform_1(%arg0: i32) -> (i32, i32) {
    %c0_i32 = arith.constant 0 : i32
    %c0_i32_0 = arith.constant 0 : i32
    %c0_i32_1 = arith.constant 0 : i32
    return %c0_i32, %c0_i32_0 : i32, i32
  }
  func.func @transform_2(%arg0: i32) -> (i32, i32) {
    %c0_i32 = arith.constant 0 : i32
    %c0_i32_0 = arith.constant 0 : i32
    return %c0_i32, %arg0 : i32, i32
  }
  func.func @transform_3(%arg0: i32) -> (i32, i32) {
    %c0_i32 = arith.constant 0 : i32
    %c0_i32_0 = arith.constant 0 : i32
    return %c0_i32, %arg0 : i32, i32
  }
}

</mosaic_0001>

<bundles_post_ra>
// kernel: hard_binary_conv3d.1
= control target key start
LH: loop header
LB: loop body
LE: loop exit
PB: predicated region body
PF: predicated region fallthrough
CT: control target
= control target key end

     0   :  { %s1590_s0 = inlined_call_operand.<no memory space> [shape: f32[1,1], index: 0, kind: input, shape index: {}]   ;;  %s1591_s1 = inlined_call_operand.vmem [shape: bf16[8,288], index: 1, kind: input, shape index: {}]   ;;  %s1592_s2 = inlined_call_operand.vmem [shape: bf16[288,7680], index: 2, kind: input, shape index: {}]   ;;  %s1593_s3 = inlined_call_operand.vmem [shape: f32[8,7680], index: 3, kind: output, shape index: {}]  }
   0x1   :  { %8 = sst [smem:[#allocation2]] %s1590_s0 }
   0x2   :  { %s1304_s14 = smov 0   ;;  %s1306_s15 = smov 0  }
   0x3   :  { %s1308_s16 = smov 0  }
   0x4 LB: > { %s1021_s0 = sadd.s32 4294967295, %s1278_s16   ;;  %s1321_s17 = sadd.s32 1, %s1278_s16   ;;  %s1278_s16 = sphi %s1308_s16, %s1596_s16   ;;  %s1274_s15 = sphi %s1306_s15, %s1595_s15   ;;  %s1270_s14 = sphi %s1304_s14, %s1594_s14  }
   0x5   : > { %s60_s18 = ssub.s32 %s1278_s16, %s1321_s17  ;;  %s63_s19 = sadd.s32 1, %s1274_s15 }
   0x6   : > { %p61_p0 = scmp.eq.s32.totalorder %s60_s18, 0  ;;  %p70_p1 = scmp.ne.s32.totalorder %s1274_s15, %s1270_s14 }
   0x7   : > { %p71_p2 = scmp.eq.s32.totalorder %s1278_s16, 0  ;;  %p1024_p4 = scmp.ge.s32.totalorder %s1278_s16, 15 }
   0x8   : > { %s1330_s20 = scalar_select %p61_p0, %s1274_s15, %s63_s19  }
   0x9   : > { %p72_p3 = por %p71_p2, %p70_p1  ;;  %128 = sbr.rel (%p1024_p4) target bundleno = 57 (0x39), region = 24 }
  0x10   : > { %131 = sbr.rel (!%p72_p3) target bundleno = 57 (0x39), region = 28  ;;  %s133_s21 = sand.u32 (%p72_p3), 1, %s1274_s15  }
  0x11   : > { %s1109_s22 = sshll.u32 (%p72_p3), %s1278_s16, 4  ;;  %s1118_s23 = smul.u32 (%p72_p3), 576, %s133_s21 }
  0x12   : > { %s1338_s26 = scalar_lea.vmem (%p72_p3), %s1592_s2, %s1109_s22 }
  0x13   : > { %v151_v0 = vld [vmem:[%s1338_s26] sm:$0xff] (%p72_p3)  ;;  %v153_v1 = vld [vmem:[%s1338_s26 + $0x8] sm:$0xff] (%p72_p3)  ;;  %v155_v2 = vld [vmem:[%s1338_s26 + $0xf0] sm:$0xff] (%p72_p3)  ;;  %s1346_s27 = scalar_lea.vmem (%p72_p3), [#allocation3], %s1118_s23 }
  0x14   : > { %v157_v3 = vld [vmem:[%s1338_s26 + $0xf8] sm:$0xff] (%p72_p3)  ;;  %v159_v4 = vld [vmem:[%s1338_s26 + $0x1e0] sm:$0xff] (%p72_p3)  ;;  %v161_v5 = vld [vmem:[%s1338_s26 + $0x1e8] sm:$0xff] (%p72_p3)  ;;  %152 = vst [vmem:[%s1346_s27] sm:$0xff] (%p72_p3), %v151_v0 }
  0x15   : > { %154 = vst [vmem:[%s1346_s27 + $0x8] sm:$0xff] (%p72_p3), %v153_v1  ;;  %156 = vst [vmem:[%s1346_s27 + $0x10] sm:$0xff] (%p72_p3), %v155_v2  ;;  %v163_v6 = vld [vmem:[%s1338_s26 + $0x2d0] sm:$0xff] (%p72_p3)  ;;  %v165_v7 = vld [vmem:[%s1338_s26 + $0x2d8] sm:$0xff] (%p72_p3) }
  0x16   : > { %158 = vst [vmem:[%s1346_s27 + $0x18] sm:$0xff] (%p72_p3), %v157_v3  ;;  %160 = vst [vmem:[%s1346_s27 + $0x20] sm:$0xff] (%p72_p3), %v159_v4  ;;  %v167_v8 = vld [vmem:[%s1338_s26 + $0x3c0] sm:$0xff] (%p72_p3)  ;;  %v169_v9 = vld [vmem:[%s1338_s26 + $0x3c8] sm:$0xff] (%p72_p3) }
  0x17   : > { %162 = vst [vmem:[%s1346_s27 + $0x28] sm:$0xff] %v161_v5  ;;  %164 = vst [vmem:[%s1346_s27 + $0x30] sm:$0xff] %v163_v6  ;;  %v171_v10 = vld [vmem:[%s1338_s26 + $0x4b0] sm:$0xff]  ;;  %v173_v11 = vld [vmem:[%s1338_s26 + $0x4b8] sm:$0xff] }
  0x18   : > { %166 = vst [vmem:[%s1346_s27 + $0x38] sm:$0xff] %v165_v7  ;;  %168 = vst [vmem:[%s1346_s27 + $0x40] sm:$0xff] %v167_v8  ;;  %v175_v12 = vld [vmem:[%s1338_s26 + $0x5a0] sm:$0xff]  ;;  %v177_v13 = vld [vmem:[%s1338_s26 + $0x5a8] sm:$0xff] }
  0x19   : > { %170 = vst [vmem:[%s1346_s27 + $0x48] sm:$0xff] %v169_v9  ;;  %172 = vst [vmem:[%s1346_s27 + $0x50] sm:$0xff] %v171_v10  ;;  %v179_v14 = vld [vmem:[%s1338_s26 + $0x690] sm:$0xff]  ;;  %v181_v15 = vld [vmem:[%s1338_s26 + $0x698] sm:$0xff] }
  0x1a   : > { %174 = vst [vmem:[%s1346_s27 + $0x58] sm:$0xff] %v173_v11  ;;  %176 = vst [vmem:[%s1346_s27 + $0x60] sm:$0xff] %v175_v12  ;;  %v183_v16 = vld [vmem:[%s1338_s26 + $0x780] sm:$0xff]  ;;  %v185_v17 = vld [vmem:[%s1338_s26 + $0x788] sm:$0xff] }
  0x1b   : > { %178 = vst [vmem:[%s1346_s27 + $0x68] sm:$0xff] %v177_v13  ;;  %180 = vst [vmem:[%s1346_s27 + $0x70] sm:$0xff] %v179_v14  ;;  %v187_v18 = vld [vmem:[%s1338_s26 + $0x870] sm:$0xff]  ;;  %v189_v19 = vld [vmem:[%s1338_s26 + $0x878] sm:$0xff] }
  0x1c   : > { %182 = vst [vmem:[%s1346_s27 + $0x78] sm:$0xff] %v181_v15  ;;  %184 = vst [vmem:[%s1346_s27 + $0x80] sm:$0xff] %v183_v16  ;;  %v191_v20 = vld [vmem:[%s1338_s26 + $0x960] sm:$0xff]  ;;  %v193_v21 = vld [vmem:[%s1338_s26 + $0x968] sm:$0xff] }
  0x1d   : > { %186 = vst [vmem:[%s1346_s27 + $0x88] sm:$0xff] %v185_v17  ;;  %188 = vst [vmem:[%s1346_s27 + $0x90] sm:$0xff] %v187_v18  ;;  %v195_v22 = vld [vmem:[%s1338_s26 + $0xa50] sm:$0xff]  ;;  %v197_v23 = vld [vmem:[%s1338_s26 + $0xa58] sm:$0xff] }
  0x1e   : > { %190 = vst [vmem:[%s1346_s27 + $0x98] sm:$0xff] %v189_v19  ;;  %192 = vst [vmem:[%s1346_s27 + $0xa0] sm:$0xff] %v191_v20  ;;  %v199_v24 = vld [vmem:[%s1338_s26 + $0xb40] sm:$0xff]  ;;  %v201_v25 = vld [vmem:[%s1338_s26 + $0xb48] sm:$0xff] }
  0x1f   : > { %194 = vst [vmem:[%s1346_s27 + $0xa8] sm:$0xff] %v193_v21  ;;  %196 = vst [vmem:[%s1346_s27 + $0xb0] sm:$0xff] %v195_v22  ;;  %v203_v26 = vld [vmem:[%s1338_s26 + $0xc30] sm:$0xff]  ;;  %v205_v27 = vld [vmem:[%s1338_s26 + $0xc38] sm:$0xff] }
  0x20   : > { %198 = vst [vmem:[%s1346_s27 + $0xb8] sm:$0xff] %v197_v23  ;;  %200 = vst [vmem:[%s1346_s27 + $0xc0] sm:$0xff] %v199_v24  ;;  %v207_v28 = vld [vmem:[%s1338_s26 + $0xd20] sm:$0xff]  ;;  %v209_v29 = vld [vmem:[%s1338_s26 + $0xd28] sm:$0xff] }
  0x21   : > { %202 = vst [vmem:[%s1346_s27 + $0xc8] sm:$0xff] %v201_v25  ;;  %204 = vst [vmem:[%s1346_s27 + $0xd0] sm:$0xff] %v203_v26  ;;  %v211_v30 = vld [vmem:[%s1338_s26 + $0xe10] sm:$0xff]  ;;  %v213_v31 = vld [vmem:[%s1338_s26 + $0xe18] sm:$0xff] }
  0x22   : > { %206 = vst [vmem:[%s1346_s27 + $0xd8] sm:$0xff] %v205_v27  ;;  %208 = vst [vmem:[%s1346_s27 + $0xe0] sm:$0xff] %v207_v28  ;;  %v215_v32 = vld [vmem:[%s1338_s26 + $0xf00] sm:$0xff]  ;;  %v217_v33 = vld [vmem:[%s1338_s26 + $0xf08] sm:$0xff] }
  0x23   : > { %210 = vst [vmem:[%s1346_s27 + $0xe8] sm:$0xff] %v209_v29  ;;  %212 = vst [vmem:[%s1346_s27 + $0xf0] sm:$0xff] %v211_v30  ;;  %v219_v34 = vld [vmem:[%s1338_s26 + $0xff0] sm:$0xff]  ;;  %v221_v35 = vld [vmem:[%s1338_s26 + $0xff8] sm:$0xff] }
  0x24   : > { %214 = vst [vmem:[%s1346_s27 + $0xf8] sm:$0xff] %v213_v31  ;;  %216 = vst [vmem:[%s1346_s27 + $0x100] sm:$0xff] %v215_v32  ;;  %v223_v36 = vld [vmem:[%s1338_s26 + $0x10e0] sm:$0xff]  ;;  %v225_v37 = vld [vmem:[%s1338_s26 + $0x10e8] sm:$0xff] }
  0x25   : > { %218 = vst [vmem:[%s1346_s27 + $0x108] sm:$0xff] %v217_v33  ;;  %220 = vst [vmem:[%s1346_s27 + $0x110] sm:$0xff] %v219_v34  ;;  %v227_v38 = vld [vmem:[%s1338_s26 + $0x11d0] sm:$0xff]  ;;  %v229_v39 = vld [vmem:[%s1338_s26 + $0x11d8] sm:$0xff] }
  0x26   : > { %222 = vst [vmem:[%s1346_s27 + $0x118] sm:$0xff] %v221_v35  ;;  %224 = vst [vmem:[%s1346_s27 + $0x120] sm:$0xff] %v223_v36  ;;  %v231_v40 = vld [vmem:[%s1338_s26 + $0x12c0] sm:$0xff]  ;;  %v233_v41 = vld [vmem:[%s1338_s26 + $0x12c8] sm:$0xff] }
  0x27   : > { %226 = vst [vmem:[%s1346_s27 + $0x128] sm:$0xff] %v225_v37  ;;  %228 = vst [vmem:[%s1346_s27 + $0x130] sm:$0xff] %v227_v38  ;;  %v235_v42 = vld [vmem:[%s1338_s26 + $0x13b0] sm:$0xff]  ;;  %v237_v43 = vld [vmem:[%s1338_s26 + $0x13b8] sm:$0xff] }
  0x28   : > { %230 = vst [vmem:[%s1346_s27 + $0x138] sm:$0xff] %v229_v39  ;;  %232 = vst [vmem:[%s1346_s27 + $0x140] sm:$0xff] %v231_v40  ;;  %v239_v44 = vld [vmem:[%s1338_s26 + $0x14a0] sm:$0xff]  ;;  %v241_v45 = vld [vmem:[%s1338_s26 + $0x14a8] sm:$0xff] }
  0x29   : > { %234 = vst [vmem:[%s1346_s27 + $0x148] sm:$0xff] %v233_v41  ;;  %236 = vst [vmem:[%s1346_s27 + $0x150] sm:$0xff] %v235_v42  ;;  %v243_v46 = vld [vmem:[%s1338_s26 + $0x1590] sm:$0xff]  ;;  %v245_v47 = vld [vmem:[%s1338_s26 + $0x1598] sm:$0xff] }
  0x2a   : > { %238 = vst [vmem:[%s1346_s27 + $0x158] sm:$0xff] %v237_v43  ;;  %240 = vst [vmem:[%s1346_s27 + $0x160] sm:$0xff] %v239_v44  ;;  %v247_v48 = vld [vmem:[%s1338_s26 + $0x1680] sm:$0xff]  ;;  %v249_v49 = vld [vmem:[%s1338_s26 + $0x1688] sm:$0xff] }
  0x2b   : > { %242 = vst [vmem:[%s1346_s27 + $0x168] sm:$0xff] %v241_v45  ;;  %244 = vst [vmem:[%s1346_s27 + $0x170] sm:$0xff] %v243_v46  ;;  %v251_v50 = vld [vmem:[%s1338_s26 + $0x1770] sm:$0xff]  ;;  %v253_v51 = vld [vmem:[%s1338_s26 + $0x1778] sm:$0xff] }
  0x2c   : > { %246 = vst [vmem:[%s1346_s27 + $0x178] sm:$0xff] %v245_v47  ;;  %248 = vst [vmem:[%s1346_s27 + $0x180] sm:$0xff] %v247_v48  ;;  %v255_v52 = vld [vmem:[%s1338_s26 + $0x1860] sm:$0xff]  ;;  %v257_v53 = vld [vmem:[%s1338_s26 + $0x1868] sm:$0xff] }
  0x2d   : > { %250 = vst [vmem:[%s1346_s27 + $0x188] sm:$0xff] %v249_v49  ;;  %252 = vst [vmem:[%s1346_s27 + $0x190] sm:$0xff] %v251_v50  ;;  %v259_v54 = vld [vmem:[%s1338_s26 + $0x1950] sm:$0xff]  ;;  %v261_v55 = vld [vmem:[%s1338_s26 + $0x1958] sm:$0xff] }
  0x2e   : > { %254 = vst [vmem:[%s1346_s27 + $0x198] sm:$0xff] %v253_v51  ;;  %256 = vst [vmem:[%s1346_s27 + $0x1a0] sm:$0xff] %v255_v52  ;;  %v263_v56 = vld [vmem:[%s1338_s26 + $0x1a40] sm:$0xff]  ;;  %v265_v57 = vld [vmem:[%s1338_s26 + $0x1a48] sm:$0xff] }
  0x2f   : > { %258 = vst [vmem:[%s1346_s27 + $0x1a8] sm:$0xff] %v257_v53  ;;  %260 = vst [vmem:[%s1346_s27 + $0x1b0] sm:$0xff] %v259_v54  ;;  %v267_v58 = vld [vmem:[%s1338_s26 + $0x1b30] sm:$0xff]  ;;  %v269_v59 = vld [vmem:[%s1338_s26 + $0x1b38] sm:$0xff] }
  0x30   : > { %262 = vst [vmem:[%s1346_s27 + $0x1b8] sm:$0xff] %v261_v55  ;;  %264 = vst [vmem:[%s1346_s27 + $0x1c0] sm:$0xff] %v263_v56  ;;  %v271_v60 = vld [vmem:[%s1338_s26 + $0x1c20] sm:$0xff]  ;;  %v273_v61 = vld [vmem:[%s1338_s26 + $0x1c28] sm:$0xff] }
  0x31   : > { %266 = vst [vmem:[%s1346_s27 + $0x1c8] sm:$0xff] %v265_v57  ;;  %268 = vst [vmem:[%s1346_s27 + $0x1d0] sm:$0xff] %v267_v58  ;;  %v275_v62 = vld [vmem:[%s1338_s26 + $0x1d10] sm:$0xff]  ;;  %v277_v63 = vld [vmem:[%s1338_s26 + $0x1d18] sm:$0xff] }
  0x32   : > { %270 = vst [vmem:[%s1346_s27 + $0x1d8] sm:$0xff] %v269_v59  ;;  %272 = vst [vmem:[%s1346_s27 + $0x1e0] sm:$0xff] %v271_v60  ;;  %v279_v0 = vld [vmem:[%s1338_s26 + $0x1e00] sm:$0xff]  ;;  %v281_v1 = vld [vmem:[%s1338_s26 + $0x1e08] sm:$0xff] }
  0x33   : > { %274 = vst [vmem:[%s1346_s27 + $0x1e8] sm:$0xff] %v273_v61  ;;  %276 = vst [vmem:[%s1346_s27 + $0x1f0] sm:$0xff] %v275_v62  ;;  %v283_v2 = vld [vmem:[%s1338_s26 + $0x1ef0] sm:$0xff]  ;;  %v285_v3 = vld [vmem:[%s1338_s26 + $0x1ef8] sm:$0xff] }
  0x34   : > { %278 = vst [vmem:[%s1346_s27 + $0x1f8] sm:$0xff] %v277_v63  ;;  %280 = vst [vmem:[%s1346_s27 + $0x200] sm:$0xff] %v279_v0  ;;  %v287_v4 = vld [vmem:[%s1338_s26 + $0x1fe0] sm:$0xff]  ;;  %v289_v5 = vld [vmem:[%s1338_s26 + $0x1fe8] sm:$0xff] }
  0x35   : > { %282 = vst [vmem:[%s1346_s27 + $0x208] sm:$0xff] %v281_v1  ;;  %284 = vst [vmem:[%s1346_s27 + $0x210] sm:$0xff] %v283_v2  ;;  %v291_v6 = vld [vmem:[%s1338_s26 + $0x20d0] sm:$0xff]  ;;  %v293_v7 = vld [vmem:[%s1338_s26 + $0x20d8] sm:$0xff] }
  0x36   : > { %286 = vst [vmem:[%s1346_s27 + $0x218] sm:$0xff] %v285_v3  ;;  %288 = vst [vmem:[%s1346_s27 + $0x220] sm:$0xff] %v287_v4 }
  0x37   : > { %290 = vst [vmem:[%s1346_s27 + $0x228] sm:$0xff] %v289_v5  ;;  %292 = vst [vmem:[%s1346_s27 + $0x230] sm:$0xff] %v291_v6 }
  0x38   : > { %294 = vst [vmem:[%s1346_s27 + $0x238] sm:$0xff] %v293_v7 }
  0x39 PF: > { %p1027_p5 = scmp.ge.s32.totalorder %s1278_s16, 1  ;;  %p299_p6 = scmp.lt.s32.totalorder %s1278_s16, 16 }
  0x3b   : > { %p300_p7 = pnand %p1027_p5, %p299_p6 }
  0x3c   : > { %s306_s28 = sand.u32 (!%p300_p7), 1, %s1270_s14   ;;  %v1492_v8 = vld [vmem:[%s1591_s1] sm:$0xff] (!%p300_p7)  ;;  %vm781_vm0 = vcmask (!%p300_p7), 261120   ;;  %s1028_s8 = sshll.u32 (!%p300_p7), %s1021_s0, 2 }
  0x3d   : > { %303 = sbr.rel (%p300_p7) target bundleno = 358 (0x166), region = 51  ;;  %v1031_v9 = vcombine.high (!%p300_p7), %v1492_v8, %v1492_v8  ;;  %p331_p8 = scmp.lt.s32.totalorder (!%p300_p7), %s1028_s8, 59 }
  0x3e   : > { %s1119_s4 = smul.u32 (!%p300_p7), 576, %s306_s28  ;;  %s949_s9 = sld [smem:[#allocation2]] (!%p300_p7) }
  0x3f   : > { %817 = vmatprep.mubr.bf16.mxu0 (!%p300_p7), %v1031_v9  ;;  %899 = vmatprep.mubr.bf16.mxu1 (!%p300_p7), %v1031_v9 }
  0x40   : > { %s1496_s5 = scalar_lea.vmem (!%p300_p7), [#allocation3], %s1119_s4 }
  0x41   : > { %v1145_v10 = vld [vmem:[%s1496_s5 + $0x4] ss:$16 sps:$4 sm:$0xff] (!%p300_p7)   ;;  %v1147_v11 = vld [vmem:[%s1496_s5 + $0xc] ss:$16 sps:$4 sm:$0xff] (!%p300_p7)   ;;  %v1149_v12 = vld [vmem:[%s1496_s5] ss:$16 sps:$4 sm:$0xff] (!%p300_p7)  }
  0x42   : > { %785 = vmatprep.subr.bf16.mxu0 (!%p300_p7), %v1145_v10  ;;  %v1150_v13 = vld [vmem:[%s1496_s5 + $0x8] ss:$16 sps:$4 sm:$0xff] (!%p300_p7)   ;;  %867 = vmatprep.subr.bf16.mxu1 (!%p300_p7), %v1147_v11  ;;  %v1151_v14 = vld [vmem:[%s1496_s5 + $0x24] ss:$16 sps:$4 sm:$0xff] (!%p300_p7)   ;;  %v1153_v15 = vld [vmem:[%s1496_s5 + $0x2c] ss:$16 sps:$4 sm:$0xff] (!%p300_p7)  }
  0x43   : > { %786 = vmatpush1.bf16.msra.mxu0 (!%p300_p7), %v1149_v12  ;;  %868 = vmatpush1.bf16.msra.mxu1 (!%p300_p7), %v1150_v13  ;;  %v1155_v16 = vld [vmem:[%s1496_s5 + $0x20] ss:$16 sps:$4 sm:$0xff] (!%p300_p7)   ;;  %v1156_v17 = vld [vmem:[%s1496_s5 + $0x28] ss:$16 sps:$4 sm:$0xff] (!%p300_p7)   ;;  %v1157_v18 = vld [vmem:[%s1496_s5 + $0x44] ss:$16 sps:$4 sm:$0xff] (!%p300_p7)   ;;  %v1030_v13 = vcombine.low (!%p300_p7), %v1492_v8, %v1492_v8 }
  0x44   : > { %787 = vmatprep.subr.bf16.mxu0 %v1151_v14  ;;  %869 = vmatprep.subr.bf16.mxu1 %v1153_v15  ;;  %v1159_v19 = vld [vmem:[%s1496_s5 + $0x4c] ss:$16 sps:$4 sm:$0xff]   ;;  %v1161_v20 = vld [vmem:[%s1496_s5 + $0x40] ss:$16 sps:$4 sm:$0xff]   ;;  %v1162_v21 = vld [vmem:[%s1496_s5 + $0x48] ss:$16 sps:$4 sm:$0xff]  }
  0x45   : > { %v1163_v22 = vld [vmem:[%s1496_s5 + $0x64] ss:$16 sps:$4 sm:$0xff]   ;;  %v1165_v23 = vld [vmem:[%s1496_s5 + $0x6c] ss:$16 sps:$4 sm:$0xff]   ;;  %v1167_v24 = vld [vmem:[%s1496_s5 + $0x60] ss:$16 sps:$4 sm:$0xff]  }
  0x46   : > { %v1168_v25 = vld [vmem:[%s1496_s5 + $0x68] ss:$16 sps:$4 sm:$0xff]   ;;  %v1169_v26 = vld [vmem:[%s1496_s5 + $0x84] ss:$16 sps:$4 sm:$0xff]   ;;  %v1171_v27 = vld [vmem:[%s1496_s5 + $0x8c] ss:$16 sps:$4 sm:$0xff]  }
  0x47   : > { %788 = vmatpush1.bf16.msra.mxu0 %v1155_v16  ;;  %870 = vmatpush1.bf16.msra.mxu1 %v1156_v17  ;;  %v1173_v28 = vld [vmem:[%s1496_s5 + $0x80] ss:$16 sps:$4 sm:$0xff]   ;;  %v1174_v29 = vld [vmem:[%s1496_s5 + $0x88] ss:$16 sps:$4 sm:$0xff]   ;;  %v1175_v30 = vld [vmem:[%s1496_s5 + $0xa4] ss:$16 sps:$4 sm:$0xff]  }
  0x48   : > { %789 = vmatprep.subr.bf16.mxu0 %v1157_v18  ;;  %871 = vmatprep.subr.bf16.mxu1 %v1159_v19  ;;  %v1177_v31 = vld [vmem:[%s1496_s5 + $0xac] ss:$16 sps:$4 sm:$0xff]   ;;  %v1179_v32 = vld [vmem:[%s1496_s5 + $0xa0] ss:$16 sps:$4 sm:$0xff]   ;;  %v1180_v33 = vld [vmem:[%s1496_s5 + $0xa8] ss:$16 sps:$4 sm:$0xff]  }
  0x49   : > { %v1181_v34 = vld [vmem:[%s1496_s5 + $0xc4] ss:$16 sps:$4 sm:$0xff]   ;;  %v1183_v35 = vld [vmem:[%s1496_s5 + $0xcc] ss:$16 sps:$4 sm:$0xff]   ;;  %v1185_v36 = vld [vmem:[%s1496_s5 + $0xc0] ss:$16 sps:$4 sm:$0xff]  }
  0x4a   : > { %v1186_v37 = vld [vmem:[%s1496_s5 + $0xc8] ss:$16 sps:$4 sm:$0xff]   ;;  %v1187_v38 = vld [vmem:[%s1496_s5 + $0xe4] ss:$16 sps:$4 sm:$0xff]   ;;  %v1189_v39 = vld [vmem:[%s1496_s5 + $0xec] ss:$16 sps:$4 sm:$0xff]  }
  0x4b   : > { %790 = vmatpush1.bf16.msra.mxu0 %v1161_v20  ;;  %872 = vmatpush1.bf16.msra.mxu1 %v1162_v21  ;;  %v1191_v40 = vld [vmem:[%s1496_s5 + $0xe0] ss:$16 sps:$4 sm:$0xff]   ;;  %v1192_v41 = vld [vmem:[%s1496_s5 + $0xe8] ss:$16 sps:$4 sm:$0xff]   ;;  %v1193_v42 = vld [vmem:[%s1496_s5 + $0x104] ss:$16 sps:$4 sm:$0xff]   ;;  %v950_v21 = vstv %s949_s9 }
  0x4c   : > { %791 = vmatprep.subr.bf16.mxu0 %v1163_v22  ;;  %873 = vmatprep.subr.bf16.mxu1 %v1165_v23  ;;  %v1195_v43 = vld [vmem:[%s1496_s5 + $0x10c] ss:$16 sps:$4 sm:$0xff]   ;;  %v1197_v44 = vld [vmem:[%s1496_s5 + $0x100] ss:$16 sps:$4 sm:$0xff]   ;;  %v1198_v45 = vld [vmem:[%s1496_s5 + $0x108] ss:$16 sps:$4 sm:$0xff]  }
  0x4d   : > { %v1199_v46 = vld [vmem:[%s1496_s5 + $0x124] ss:$16 sps:$4 sm:$0xff]   ;;  %v1201_v47 = vld [vmem:[%s1496_s5 + $0x12c] ss:$16 sps:$4 sm:$0xff]   ;;  %v1203_v48 = vld [vmem:[%s1496_s5 + $0x120] ss:$16 sps:$4 sm:$0xff]  }
  0x4e   : > { %v1204_v49 = vld [vmem:[%s1496_s5 + $0x128] ss:$16 sps:$4 sm:$0xff]   ;;  %v1205_v50 = vld [vmem:[%s1496_s5 + $0x144] ss:$16 sps:$4 sm:$0xff]   ;;  %v1207_v51 = vld [vmem:[%s1496_s5 + $0x14c] ss:$16 sps:$4 sm:$0xff]  }
  0x4f   : > { %792 = vmatpush1.bf16.msra.mxu0 %v1167_v24  ;;  %874 = vmatpush1.bf16.msra.mxu1 %v1168_v25  ;;  %v1209_v52 = vld [vmem:[%s1496_s5 + $0x140] ss:$16 sps:$4 sm:$0xff]   ;;  %v1210_v53 = vld [vmem:[%s1496_s5 + $0x148] ss:$16 sps:$4 sm:$0xff]   ;;  %v1211_v54 = vld [vmem:[%s1496_s5 + $0x164] ss:$16 sps:$4 sm:$0xff]  }
  0x50   : > { %793 = vmatprep.subr.bf16.mxu0 %v1169_v26  ;;  %875 = vmatprep.subr.bf16.mxu1 %v1171_v27  ;;  %v1213_v55 = vld [vmem:[%s1496_s5 + $0x16c] ss:$16 sps:$4 sm:$0xff]   ;;  %v1215_v56 = vld [vmem:[%s1496_s5 + $0x160] ss:$16 sps:$4 sm:$0xff]   ;;  %v1216_v57 = vld [vmem:[%s1496_s5 + $0x168] ss:$16 sps:$4 sm:$0xff]  }
  0x51   : > { %v1217_v58 = vld [vmem:[%s1496_s5 + $0x184] ss:$16 sps:$4 sm:$0xff]   ;;  %v1219_v59 = vld [vmem:[%s1496_s5 + $0x18c] ss:$16 sps:$4 sm:$0xff]   ;;  %v1221_v60 = vld [vmem:[%s1496_s5 + $0x180] ss:$16 sps:$4 sm:$0xff]  }
  0x52   : > { %v1222_v61 = vld [vmem:[%s1496_s5 + $0x188] ss:$16 sps:$4 sm:$0xff]   ;;  %v1223_v62 = vld [vmem:[%s1496_s5 + $0x1a4] ss:$16 sps:$4 sm:$0xff]   ;;  %v1225_v63 = vld [vmem:[%s1496_s5 + $0x1ac] ss:$16 sps:$4 sm:$0xff]  }
  0x53   : > { %794 = vmatpush1.bf16.msra.mxu0 %v1173_v28  ;;  %876 = vmatpush1.bf16.msra.mxu1 %v1174_v29  ;;  %v1227_v0 = vld [vmem:[%s1496_s5 + $0x1a0] ss:$16 sps:$4 sm:$0xff]   ;;  %v1228_v1 = vld [vmem:[%s1496_s5 + $0x1a8] ss:$16 sps:$4 sm:$0xff]   ;;  %v1229_v2 = vld [vmem:[%s1496_s5 + $0x1c4] ss:$16 sps:$4 sm:$0xff]  }
  0x54   : > { %795 = vmatprep.subr.bf16.mxu0 %v1175_v30  ;;  %877 = vmatprep.subr.bf16.mxu1 %v1177_v31  ;;  %v1231_v3 = vld [vmem:[%s1496_s5 + $0x1cc] ss:$16 sps:$4 sm:$0xff]   ;;  %v1233_v4 = vld [vmem:[%s1496_s5 + $0x1c0] ss:$16 sps:$4 sm:$0xff]   ;;  %v1234_v5 = vld [vmem:[%s1496_s5 + $0x1c8] ss:$16 sps:$4 sm:$0xff]  }
  0x55   : > { %v1235_v6 = vld [vmem:[%s1496_s5 + $0x1e4] ss:$16 sps:$4 sm:$0xff]   ;;  %v1237_v7 = vld [vmem:[%s1496_s5 + $0x1ec] ss:$16 sps:$4 sm:$0xff]   ;;  %v1239_v9 = vld [vmem:[%s1496_s5 + $0x1e0] ss:$16 sps:$4 sm:$0xff]  }
  0x56   : > { %v1240_v10 = vld [vmem:[%s1496_s5 + $0x1e8] ss:$16 sps:$4 sm:$0xff]   ;;  %v1245_v11 = vld [vmem:[%s1496_s5 + $0x204] ss:$16 sps:$4 sm:$0xff]   ;;  %v1248_v12 = vld [vmem:[%s1496_s5 + $0x20c] ss:$16 sps:$4 sm:$0xff]  }
  0x57   : > { %796 = vmatpush1.bf16.msra.mxu0 %v1179_v32  ;;  %878 = vmatpush1.bf16.msra.mxu1 %v1180_v33  ;;  %v1243_v14 = vld [vmem:[%s1496_s5 + $0x200] ss:$16 sps:$4 sm:$0xff]   ;;  %v1246_v15 = vld [vmem:[%s1496_s5 + $0x208] ss:$16 sps:$4 sm:$0xff]   ;;  %v1251_v16 = vld [vmem:[%s1496_s5 + $0x224] ss:$16 sps:$4 sm:$0xff]  }
  0x58   : > { %797 = vmatprep.subr.bf16.mxu0 %v1181_v34  ;;  %879 = vmatprep.subr.bf16.mxu1 %v1183_v35  ;;  %v1254_v17 = vld [vmem:[%s1496_s5 + $0x22c] ss:$16 sps:$4 sm:$0xff]   ;;  %v1249_v18 = vld [vmem:[%s1496_s5 + $0x220] ss:$16 sps:$4 sm:$0xff]   ;;  %v1252_v19 = vld [vmem:[%s1496_s5 + $0x228] ss:$16 sps:$4 sm:$0xff]  }
  0x59   : > { %v1280_v20 = vmov 0   ;;  %v1255_v8 = vld [vmem:[%s1591_s1 + $0x8] ss:$0 sps:$4 sm:$0xff]   ;;  %s1598_s8 = smov (!%p331_p8, %s1028_s8), 59 }
  0x5a   : > { %s1029_s10 = sshll.u32 %s1598_s8, 3 }
  0x5b   : > { %798 = vmatpush1.bf16.msra.mxu0 %v1185_v36  ;;  %880 = vmatpush1.bf16.msra.mxu1 %v1186_v37  ;;  %s334_s13 = scalar_lea.vmem %s1593_s3, %s1029_s10 }
  0x5c   : > { %799 = vmatprep.subr.bf16.mxu0 %v1187_v38  ;;  %881 = vmatprep.subr.bf16.mxu1 %v1189_v39 }
  0x5f   : > { %800 = vmatpush1.bf16.msra.mxu0 %v1191_v40  ;;  %882 = vmatpush1.bf16.msra.mxu1 %v1192_v41 }
  0x60   : > { %801 = vmatprep.subr.bf16.mxu0 %v1193_v42  ;;  %883 = vmatprep.subr.bf16.mxu1 %v1195_v43 }
  0x63   : > { %802 = vmatpush1.bf16.msra.mxu0 %v1197_v44  ;;  %884 = vmatpush1.bf16.msra.mxu1 %v1198_v45 }
  0x64   : > { %803 = vmatprep.subr.bf16.mxu0 %v1199_v46  ;;  %885 = vmatprep.subr.bf16.mxu1 %v1201_v47 }
  0x67   : > { %804 = vmatpush1.bf16.msra.mxu0 %v1203_v48  ;;  %886 = vmatpush1.bf16.msra.mxu1 %v1204_v49 }
  0x68   : > { %805 = vmatprep.subr.bf16.mxu0 %v1205_v50  ;;  %887 = vmatprep.subr.bf16.mxu1 %v1207_v51 }
  0x6b   : > { %806 = vmatpush1.bf16.msra.mxu0 %v1209_v52  ;;  %888 = vmatpush1.bf16.msra.mxu1 %v1210_v53 }
  0x6c   : > { %807 = vmatprep.subr.bf16.mxu0 %v1211_v54  ;;  %889 = vmatprep.subr.bf16.mxu1 %v1213_v55 }
  0x6f   : > { %808 = vmatpush1.bf16.msra.mxu0 %v1215_v56  ;;  %890 = vmatpush1.bf16.msra.mxu1 %v1216_v57 }
  0x70   : > { %809 = vmatprep.subr.bf16.mxu0 %v1217_v58  ;;  %891 = vmatprep.subr.bf16.mxu1 %v1219_v59 }
  0x73   : > { %810 = vmatpush1.bf16.msra.mxu0 %v1221_v60  ;;  %892 = vmatpush1.bf16.msra.mxu1 %v1222_v61 }
  0x74   : > { %811 = vmatprep.subr.bf16.mxu0 %v1223_v62  ;;  %893 = vmatprep.subr.bf16.mxu1 %v1225_v63 }
  0x77   : > { %812 = vmatpush1.bf16.msra.mxu0 %v1227_v0  ;;  %894 = vmatpush1.bf16.msra.mxu1 %v1228_v1 }
  0x78   : > { %813 = vmatprep.subr.bf16.mxu0 %v1229_v2  ;;  %895 = vmatprep.subr.bf16.mxu1 %v1231_v3 }
  0x7b   : > { %814 = vmatpush1.bf16.msra.mxu0 %v1233_v4  ;;  %896 = vmatpush1.bf16.msra.mxu1 %v1234_v5 }
  0x7c   : > { %815 = vmatprep.subr.bf16.mxu0 %v1235_v6  ;;  %897 = vmatprep.subr.bf16.mxu1 %v1237_v7 }
  0x7f   : > { %816 = vmatpush1.bf16.msra.mxu0 %v1239_v9  ;;  %898 = vmatpush1.bf16.msra.mxu1 %v1240_v10 }
  0x80   : > { %826 = vmatprep.subr.bf16.mxu0 %v1245_v11  ;;  %908 = vmatprep.subr.bf16.mxu1 %v1248_v12 }
  0x82   : > { %818 = vmatmul.mubr.bf16.vlgmr.msra.gmra.mrb[0].mxu0 %v1030_v13  ;;  %900 = vmatmul.mubr.bf16.vlgmr.msra.gmra.mrb[0].mxu1 %v1030_v13 }
  0x83   : > { %827 = vmatpush1.bf16.msra.mxu0 %v1243_v14  ;;  %909 = vmatpush1.bf16.msra.mxu1 %v1246_v15 }
  0x84   : > { %828 = vmatprep.subr.bf16.mxu0 %v1251_v16  ;;  %910 = vmatprep.subr.bf16.mxu1 %v1254_v17 }
  0x85   : > { %858 = vmatprep.mubr.bf16.mxu0 %v1280_v20  ;;  %940 = vmatprep.mubr.bf16.mxu1 %v1280_v20 }
  0x87   : > { %829 = vmatpush1.bf16.msra.mxu0 %v1249_v18  ;;  %911 = vmatpush1.bf16.msra.mxu1 %v1252_v19 }
  0x8e   : > { %1105 = vmatmul.mubr.msk.bf16.vlgmr.msra.gmra.mrb[0].mxu0 %vm781_vm0, %v1255_v8  ;;  %1106 = vmatmul.mubr.msk.bf16.vlgmr.msra.gmra.mrb[0].mxu1 %vm781_vm0, %v1255_v8 }
 0x161   : > { %v860_v22 = vpop.f32.mrb[0].mxu0  ;;  %v942_v23 = vpop.f32.mrb[0].mxu1 }
 0x162   : > { %v951_v24 = vmul.f32 %v950_v21, %v860_v22  ;;  %v953_v25 = vmul.f32 %v950_v21, %v942_v23  ;;  %v862_v26 = vpop.f32.mrb[1].mxu0  ;;  %v944_v27 = vpop.f32.mrb[1].mxu1 }
 0x163   : > { %v952_v28 = vmul.f32 %v950_v21, %v862_v26  ;;  %v954_v29 = vmul.f32 %v950_v21, %v944_v27  ;;  %v864_v30 = vpop.f32.mrb[2].mxu0  ;;  %v946_v31 = vpop.f32.mrb[2].mxu1 }
 0x164   : > { %955 = vst [vmem:[%s334_s13] sm:$0xff] %v951_v24  ;;  %957 = vst [vmem:[%s334_s13 + $0x10] sm:$0xff] %v953_v25  ;;  %v865_v32 = vpop.f32.mrb[3].mxu0  ;;  %v947_v33 = vpop.f32.mrb[3].mxu1 }
 0x165   : > { %956 = vst [vmem:[%s334_s13 + $0x8] sm:$0xff] %v952_v28  ;;  %958 = vst [vmem:[%s334_s13 + $0x18] sm:$0xff] %v954_v29 }
 0x166 PF: > { %p11_p9 = scmp.ge.s32.totalorder %s1321_s17, 17   ;;  %s1594_s14 = smov %s1274_s15 }
 0x167   : > { %s1595_s15 = smov %s1330_s20  ;;  %s1596_s16 = smov %s1321_s17 }
 0x168   :  { %13 = sbr.rel (!%p11_p9) target bundleno = 4 (0x4), region = 90 }

// kernel: squeeze.1
= control target key start
LH: loop header
LB: loop body
LE: loop exit
PB: predicated region body
PF: predicated region fallthrough
CT: control target
= control target key end

     0   :  { %vm4_vm0 = vcmask 130048   ;;  %s635_s12 = smov 112   ;;  %s907_s0 = inlined_call_operand.vmem [shape: f32[7680], index: 0, kind: input, shape index: {}]   ;;  %s908_s1 = inlined_call_operand.hbm [shape: f32[2,1,15,16,16], index: 1, kind: output, shape index: {}]  }
   0x1   :  { %v656_v0 = vld [vmem:[%s907_s0 + $0x10] sm:$0xff]   ;;  %v661_v1 = vld [vmem:[%s907_s0] sm:$0xff]   ;;  %v666_v2 = vld [vmem:[%s907_s0 + $0x18] sm:$0xff]  }
   0x2   :  { %73 = vrot.lane.b32.xlu1 %v656_v0, %s635_s12  ;;  %55 = vrot.lane.b32.xlu0 %v661_v1, %s635_s12  ;;  %v673_v3 = vld [vmem:[%s907_s0 + $0x8] sm:$0xff]   ;;  %5 = vst.msk [vmem:[#allocation0] ss:$8 sm:$0xf] %vm4_vm0, %v661_v1   ;;  %v695_v5 = vld [vmem:[%s907_s0 + $0x20] sm:$0xff]  }
   0x3   :  { %v678_v4 = vld [vmem:[%s907_s0 + $0x28] sm:$0xff]   ;;  %6 = vst.msk [vmem:[#allocation0] ss:$8 sm:$0xf0] %vm4_vm0, %v661_v1   ;;  %v700_v6 = vld [vmem:[%s907_s0 + $0x30] sm:$0xff]  }
   0x4   :  { %18 = vst.msk [vmem:[#allocation0 + $0x80] ss:$8 sm:$0xf] %vm4_vm0, %v656_v0   ;;  %20 = vst.msk [vmem:[#allocation0 + $0x80] ss:$8 sm:$0xf0] %vm4_vm0, %v656_v0  }
   0x5   :  { %25 = vst.msk [vmem:[#allocation0 + $0xc0] ss:$8 sm:$0xf] %vm4_vm0, %v666_v2   ;;  %27 = vst.msk [vmem:[#allocation0 + $0xc0] ss:$8 sm:$0xf0] %vm4_vm0, %v666_v2  }
   0x6   :  { %11 = vst.msk [vmem:[#allocation0 + $0x40] ss:$8 sm:$0xf] %vm4_vm0, %v673_v3   ;;  %13 = vst.msk [vmem:[#allocation0 + $0x40] ss:$8 sm:$0xf0] %vm4_vm0, %v673_v3   ;;  %82 = vrot.lane.b32.xlu1 %v666_v2, %s635_s12  ;;  %64 = vrot.lane.b32.xlu0 %v673_v3, %s635_s12 }
   0x7   :  { %39 = vst.msk [vmem:[#allocation0 + $0x140] ss:$8 sm:$0xf] %vm4_vm0, %v678_v4   ;;  %41 = vst.msk [vmem:[#allocation0 + $0x140] ss:$8 sm:$0xf0] %vm4_vm0, %v678_v4  }
   0x8   :  { %32 = vst.msk [vmem:[#allocation0 + $0x100] ss:$8 sm:$0xf] %vm4_vm0, %v695_v5   ;;  %34 = vst.msk [vmem:[#allocation0 + $0x100] ss:$8 sm:$0xf0] %vm4_vm0, %v695_v5  }
   0x9   :  { %46 = vst.msk [vmem:[#allocation0 + $0x180] ss:$8 sm:$0xf] %vm4_vm0, %v700_v6   ;;  %48 = vst.msk [vmem:[#allocation0 + $0x180] ss:$8 sm:$0xf0] %vm4_vm0, %v700_v6  }
   0xa   :  { %2 = vsyncpa [#allocation1], 0  ;;  %100 = vrot.lane.b32.xlu1 %v678_v4, %s635_s12  ;;  %91 = vrot.lane.b32.xlu0 %v695_v5, %s635_s12  ;;  %v560_v7 = vld [vmem:[%s907_s0 + $0x38] sm:$0xf]   ;;  %s636_s23 = smov 96   ;;  %s637_s26 = smov 80  }
   0xb   :  { %v567_v8 = vld [vmem:[%s907_s0 + $0x38] sm:$0xf]   ;;  %s638_s29 = smov 64   ;;  %s639_s3 = smov 48  }
   0xc   :  { %v574_v9 = vld [vmem:[%s907_s0 + $0x38] sm:$0xf]   ;;  %s640_s6 = smov 32   ;;  %s641_s11 = smov 16  }
   0xd   :  { %v581_v10 = vld [vmem:[%s907_s0 + $0x38] sm:$0xf]  }
   0xe   :  { %118 = vrot.lane.b32.xlu1 %v560_v7, %s635_s12  ;;  %109 = vrot.lane.b32.xlu0 %v700_v6, %s635_s12  ;;  %v588_v11 = vld [vmem:[%s907_s0 + $0x38] sm:$0xf]  }
   0xf   :  { %v595_v12 = vld [vmem:[%s907_s0 + $0x38] sm:$0xf]  }
  0x10   :  { %v553_v13 = vld [vmem:[%s907_s0 + $0x38] sm:$0xf]  }
  0x11   :  { %53 = vst.msk [vmem:[#allocation0 + $0x1c0] ss:$8 sm:$0xf] %vm4_vm0, %v553_v13   ;;  %v602_v14 = vld [vmem:[%s907_s0 + $0x38] sm:$0xf]   ;;  %s642_s0 = smov [#allocation0]  }
  0x12   :  { %133 = vrot.lane.b32.xlu1 %v673_v3, %s636_s23  ;;  %124 = vrot.lane.b32.xlu0 %v661_v1, %s636_s23  ;;  %s541_s14 = sshll.u32 %s642_s0, 4  ;;  %s542_s14 = int_to_ptr.vmem [resolvable:$true] %s541_s14 }
  0x13   :  { %s611_s15 = scalar_lea.vmem %s542_s14, 7680  ;;  %p616_p1 = scmp.lt.s32.totalorder %s542_s14, %s542_s14 }
  0x14   :  { %p612_p0 = scmp.ne.s32.totalorder %s542_s14, %s611_s15  ;;  %p617_p2 = scmp.lt.s32.totalorder %s611_s15, %s611_s15 }
  0x16   :  { %151 = vrot.lane.b32.xlu1 %v666_v2, %s636_s23  ;;  %142 = vrot.lane.b32.xlu0 %v656_v0, %s636_s23  ;;  %p618_p3 = por %p617_p2, %p616_p1 }
  0x18   :  { %p619_p4 = pnand %p618_p3, %p612_p0 }
  0x1a   :  { %169 = vrot.lane.b32.xlu1 %v678_v4, %s636_s23  ;;  %160 = vrot.lane.b32.xlu0 %v695_v5, %s636_s23 }
  0x1e   :  { %187 = vrot.lane.b32.xlu1 %v567_v8, %s636_s23  ;;  %178 = vrot.lane.b32.xlu0 %v700_v6, %s636_s23 }
  0x22   :  { %202 = vrot.lane.b32.xlu1 %v673_v3, %s637_s26  ;;  %193 = vrot.lane.b32.xlu0 %v661_v1, %s637_s26 }
  0x26   :  { %220 = vrot.lane.b32.xlu1 %v666_v2, %s637_s26  ;;  %211 = vrot.lane.b32.xlu0 %v656_v0, %s637_s26 }
  0x2a   :  { %238 = vrot.lane.b32.xlu1 %v678_v4, %s637_s26  ;;  %229 = vrot.lane.b32.xlu0 %v695_v5, %s637_s26 }
  0x2e   :  { %256 = vrot.lane.b32.xlu1 %v574_v9, %s637_s26  ;;  %247 = vrot.lane.b32.xlu0 %v700_v6, %s637_s26 }
  0x32   :  { %271 = vrot.lane.b32.xlu1 %v673_v3, %s638_s29  ;;  %262 = vrot.lane.b32.xlu0 %v661_v1, %s638_s29 }
  0x36   :  { %289 = vrot.lane.b32.xlu1 %v666_v2, %s638_s29  ;;  %280 = vrot.lane.b32.xlu0 %v656_v0, %s638_s29 }
  0x3a   :  { %307 = vrot.lane.b32.xlu1 %v678_v4, %s638_s29  ;;  %298 = vrot.lane.b32.xlu0 %v695_v5, %s638_s29 }
  0x3e   :  { %325 = vrot.lane.b32.xlu1 %v581_v10, %s638_s29  ;;  %316 = vrot.lane.b32.xlu0 %v700_v6, %s638_s29 }
  0x42   :  { %340 = vrot.lane.b32.xlu1 %v673_v3, %s639_s3  ;;  %331 = vrot.lane.b32.xlu0 %v661_v1, %s639_s3 }
  0x46   :  { %358 = vrot.lane.b32.xlu1 %v666_v2, %s639_s3  ;;  %349 = vrot.lane.b32.xlu0 %v656_v0, %s639_s3 }
  0x4a   :  { %376 = vrot.lane.b32.xlu1 %v678_v4, %s639_s3  ;;  %367 = vrot.lane.b32.xlu0 %v695_v5, %s639_s3 }
  0x4e   :  { %394 = vrot.lane.b32.xlu1 %v588_v11, %s639_s3  ;;  %385 = vrot.lane.b32.xlu0 %v700_v6, %s639_s3 }
  0x52   :  { %409 = vrot.lane.b32.xlu1 %v673_v3, %s640_s6  ;;  %400 = vrot.lane.b32.xlu0 %v661_v1, %s640_s6 }
  0x56   :  { %427 = vrot.lane.b32.xlu1 %v666_v2, %s640_s6  ;;  %418 = vrot.lane.b32.xlu0 %v656_v0, %s640_s6 }
  0x5a   :  { %445 = vrot.lane.b32.xlu1 %v678_v4, %s640_s6  ;;  %436 = vrot.lane.b32.xlu0 %v695_v5, %s640_s6 }
  0x5e   :  { %463 = vrot.lane.b32.xlu1 %v595_v12, %s640_s6  ;;  %454 = vrot.lane.b32.xlu0 %v700_v6, %s640_s6 }
  0x62   :  { %478 = vrot.lane.b32.xlu1 %v673_v3, %s641_s11  ;;  %469 = vrot.lane.b32.xlu0 %v661_v1, %s641_s11 }
  0x66   :  { %496 = vrot.lane.b32.xlu1 %v666_v2, %s641_s11  ;;  %487 = vrot.lane.b32.xlu0 %v656_v0, %s641_s11 }
  0x6a   :  { %514 = vrot.lane.b32.xlu1 %v678_v4, %s641_s11  ;;  %505 = vrot.lane.b32.xlu0 %v695_v5, %s641_s11 }
  0x6e   :  { %532 = vrot.lane.b32.xlu1 %v602_v14, %s641_s11  ;;  %523 = vrot.lane.b32.xlu0 %v700_v6, %s641_s11 }
  0x74   :  { %v74_v15 = vpop.permute.xlu1 %73   ;;  %v56_v16 = vpop.permute.xlu0 %55  }
  0x75   :  { %77 = vst.msk [vmem:[#allocation0 + $0x81] ss:$8 sm:$0xf] %vm4_vm0, %v74_v15   ;;  %79 = vst.msk [vmem:[#allocation0 + $0x81] ss:$8 sm:$0xf0] %vm4_vm0, %v74_v15  }
  0x76   :  { %59 = vst.msk [vmem:[#allocation0 + $0x1] ss:$8 sm:$0xf] %vm4_vm0, %v56_v16   ;;  %61 = vst.msk [vmem:[#allocation0 + $0x1] ss:$8 sm:$0xf0] %vm4_vm0, %v56_v16  }
  0x78   :  { %v83_v17 = vpop.permute.xlu1 %82   ;;  %v65_v18 = vpop.permute.xlu0 %64  }
  0x79   :  { %86 = vst.msk [vmem:[#allocation0 + $0xc1] ss:$8 sm:$0xf] %vm4_vm0, %v83_v17   ;;  %88 = vst.msk [vmem:[#allocation0 + $0xc1] ss:$8 sm:$0xf0] %vm4_vm0, %v83_v17  }
  0x7a   :  { %68 = vst.msk [vmem:[#allocation0 + $0x41] ss:$8 sm:$0xf] %vm4_vm0, %v65_v18   ;;  %70 = vst.msk [vmem:[#allocation0 + $0x41] ss:$8 sm:$0xf0] %vm4_vm0, %v65_v18  }
  0x7c   :  { %v101_v19 = vpop.permute.xlu1 %100   ;;  %v92_v20 = vpop.permute.xlu0 %91  }
  0x7d   :  { %104 = vst.msk [vmem:[#allocation0 + $0x141] ss:$8 sm:$0xf] %vm4_vm0, %v101_v19   ;;  %106 = vst.msk [vmem:[#allocation0 + $0x141] ss:$8 sm:$0xf0] %vm4_vm0, %v101_v19  }
  0x7e   :  { %95 = vst.msk [vmem:[#allocation0 + $0x101] ss:$8 sm:$0xf] %vm4_vm0, %v92_v20   ;;  %97 = vst.msk [vmem:[#allocation0 + $0x101] ss:$8 sm:$0xf0] %vm4_vm0, %v92_v20  }
  0x80   :  { %v119_v21 = vpop.permute.xlu1 %118   ;;  %v110_v22 = vpop.permute.xlu0 %109  }
  0x81   :  { %122 = vst.msk [vmem:[#allocation0 + $0x1c1] ss:$8 sm:$0xf] %vm4_vm0, %v119_v21   ;;  %113 = vst.msk [vmem:[#allocation0 + $0x181] ss:$8 sm:$0xf] %vm4_vm0, %v110_v22  }
  0x82   :  { %115 = vst.msk [vmem:[#allocation0 + $0x181] ss:$8 sm:$0xf0] %vm4_vm0, %v110_v22  }
  0x84   :  { %v134_v23 = vpop.permute.xlu1 %133   ;;  %v125_v24 = vpop.permute.xlu0 %124  }
  0x85   :  { %137 = vst.msk [vmem:[#allocation0 + $0x42] ss:$8 sm:$0xf] %vm4_vm0, %v134_v23   ;;  %139 = vst.msk [vmem:[#allocation0 + $0x42] ss:$8 sm:$0xf0] %vm4_vm0, %v134_v23  }
  0x86   :  { %128 = vst.msk [vmem:[#allocation0 + $0x2] ss:$8 sm:$0xf] %vm4_vm0, %v125_v24   ;;  %130 = vst.msk [vmem:[#allocation0 + $0x2] ss:$8 sm:$0xf0] %vm4_vm0, %v125_v24  }
  0x88   :  { %v152_v25 = vpop.permute.xlu1 %151   ;;  %v143_v26 = vpop.permute.xlu0 %142  }
  0x89   :  { %155 = vst.msk [vmem:[#allocation0 + $0xc2] ss:$8 sm:$0xf] %vm4_vm0, %v152_v25   ;;  %157 = vst.msk [vmem:[#allocation0 + $0xc2] ss:$8 sm:$0xf0] %vm4_vm0, %v152_v25  }
  0x8a   :  { %146 = vst.msk [vmem:[#allocation0 + $0x82] ss:$8 sm:$0xf] %vm4_vm0, %v143_v26   ;;  %148 = vst.msk [vmem:[#allocation0 + $0x82] ss:$8 sm:$0xf0] %vm4_vm0, %v143_v26  }
  0x8c   :  { %v170_v27 = vpop.permute.xlu1 %169   ;;  %v161_v28 = vpop.permute.xlu0 %160  }
  0x8d   :  { %173 = vst.msk [vmem:[#allocation0 + $0x142] ss:$8 sm:$0xf] %vm4_vm0, %v170_v27   ;;  %175 = vst.msk [vmem:[#allocation0 + $0x142] ss:$8 sm:$0xf0] %vm4_vm0, %v170_v27  }
  0x8e   :  { %164 = vst.msk [vmem:[#allocation0 + $0x102] ss:$8 sm:$0xf] %vm4_vm0, %v161_v28   ;;  %166 = vst.msk [vmem:[#allocation0 + $0x102] ss:$8 sm:$0xf0] %vm4_vm0, %v161_v28  }
  0x90   :  { %v188_v29 = vpop.permute.xlu1 %187   ;;  %v179_v30 = vpop.permute.xlu0 %178  }
  0x91   :  { %191 = vst.msk [vmem:[#allocation0 + $0x1c2] ss:$8 sm:$0xf] %vm4_vm0, %v188_v29   ;;  %182 = vst.msk [vmem:[#allocation0 + $0x182] ss:$8 sm:$0xf] %vm4_vm0, %v179_v30  }
  0x92   :  { %184 = vst.msk [vmem:[#allocation0 + $0x182] ss:$8 sm:$0xf0] %vm4_vm0, %v179_v30  }
  0x94   :  { %v203_v31 = vpop.permute.xlu1 %202   ;;  %v194_v32 = vpop.permute.xlu0 %193  }
  0x95   :  { %206 = vst.msk [vmem:[#allocation0 + $0x43] ss:$8 sm:$0xf] %vm4_vm0, %v203_v31   ;;  %208 = vst.msk [vmem:[#allocation0 + $0x43] ss:$8 sm:$0xf0] %vm4_vm0, %v203_v31  }
  0x96   :  { %197 = vst.msk [vmem:[#allocation0 + $0x3] ss:$8 sm:$0xf] %vm4_vm0, %v194_v32   ;;  %199 = vst.msk [vmem:[#allocation0 + $0x3] ss:$8 sm:$0xf0] %vm4_vm0, %v194_v32  }
  0x98   :  { %v221_v33 = vpop.permute.xlu1 %220   ;;  %v212_v34 = vpop.permute.xlu0 %211  }
  0x99   :  { %224 = vst.msk [vmem:[#allocation0 + $0xc3] ss:$8 sm:$0xf] %vm4_vm0, %v221_v33   ;;  %226 = vst.msk [vmem:[#allocation0 + $0xc3] ss:$8 sm:$0xf0] %vm4_vm0, %v221_v33  }
  0x9a   :  { %215 = vst.msk [vmem:[#allocation0 + $0x83] ss:$8 sm:$0xf] %vm4_vm0, %v212_v34   ;;  %217 = vst.msk [vmem:[#allocation0 + $0x83] ss:$8 sm:$0xf0] %vm4_vm0, %v212_v34  }
  0x9c   :  { %v239_v35 = vpop.permute.xlu1 %238   ;;  %v230_v36 = vpop.permute.xlu0 %229  }
  0x9d   :  { %242 = vst.msk [vmem:[#allocation0 + $0x143] ss:$8 sm:$0xf] %vm4_vm0, %v239_v35   ;;  %244 = vst.msk [vmem:[#allocation0 + $0x143] ss:$8 sm:$0xf0] %vm4_vm0, %v239_v35  }
  0x9e   :  { %233 = vst.msk [vmem:[#allocation0 + $0x103] ss:$8 sm:$0xf] %vm4_vm0, %v230_v36   ;;  %235 = vst.msk [vmem:[#allocation0 + $0x103] ss:$8 sm:$0xf0] %vm4_vm0, %v230_v36  }
  0xa0   :  { %v257_v37 = vpop.permute.xlu1 %256   ;;  %v248_v38 = vpop.permute.xlu0 %247  }
  0xa1   :  { %260 = vst.msk [vmem:[#allocation0 + $0x1c3] ss:$8 sm:$0xf] %vm4_vm0, %v257_v37   ;;  %251 = vst.msk [vmem:[#allocation0 + $0x183] ss:$8 sm:$0xf] %vm4_vm0, %v248_v38  }
  0xa2   :  { %253 = vst.msk [vmem:[#allocation0 + $0x183] ss:$8 sm:$0xf0] %vm4_vm0, %v248_v38  }
  0xa4   :  { %v272_v39 = vpop.permute.xlu1 %271   ;;  %v263_v40 = vpop.permute.xlu0 %262  }
  0xa5   :  { %275 = vst.msk [vmem:[#allocation0 + $0x44] ss:$8 sm:$0xf] %vm4_vm0, %v272_v39   ;;  %277 = vst.msk [vmem:[#allocation0 + $0x44] ss:$8 sm:$0xf0] %vm4_vm0, %v272_v39  }
  0xa6   :  { %266 = vst.msk [vmem:[#allocation0 + $0x4] ss:$8 sm:$0xf] %vm4_vm0, %v263_v40   ;;  %268 = vst.msk [vmem:[#allocation0 + $0x4] ss:$8 sm:$0xf0] %vm4_vm0, %v263_v40  }
  0xa8   :  { %v290_v41 = vpop.permute.xlu1 %289   ;;  %v281_v42 = vpop.permute.xlu0 %280  }
  0xa9   :  { %293 = vst.msk [vmem:[#allocation0 + $0xc4] ss:$8 sm:$0xf] %vm4_vm0, %v290_v41   ;;  %295 = vst.msk [vmem:[#allocation0 + $0xc4] ss:$8 sm:$0xf0] %vm4_vm0, %v290_v41  }
  0xaa   :  { %284 = vst.msk [vmem:[#allocation0 + $0x84] ss:$8 sm:$0xf] %vm4_vm0, %v281_v42   ;;  %286 = vst.msk [vmem:[#allocation0 + $0x84] ss:$8 sm:$0xf0] %vm4_vm0, %v281_v42  }
  0xac   :  { %v308_v43 = vpop.permute.xlu1 %307   ;;  %v299_v44 = vpop.permute.xlu0 %298  }
  0xad   :  { %311 = vst.msk [vmem:[#allocation0 + $0x144] ss:$8 sm:$0xf] %vm4_vm0, %v308_v43   ;;  %313 = vst.msk [vmem:[#allocation0 + $0x144] ss:$8 sm:$0xf0] %vm4_vm0, %v308_v43  }
  0xae   :  { %302 = vst.msk [vmem:[#allocation0 + $0x104] ss:$8 sm:$0xf] %vm4_vm0, %v299_v44   ;;  %304 = vst.msk [vmem:[#allocation0 + $0x104] ss:$8 sm:$0xf0] %vm4_vm0, %v299_v44  }
  0xb0   :  { %v326_v45 = vpop.permute.xlu1 %325   ;;  %v317_v46 = vpop.permute.xlu0 %316  }
  0xb1   :  { %329 = vst.msk [vmem:[#allocation0 + $0x1c4] ss:$8 sm:$0xf] %vm4_vm0, %v326_v45   ;;  %320 = vst.msk [vmem:[#allocation0 + $0x184] ss:$8 sm:$0xf] %vm4_vm0, %v317_v46  }
  0xb2   :  { %322 = vst.msk [vmem:[#allocation0 + $0x184] ss:$8 sm:$0xf0] %vm4_vm0, %v317_v46  }
  0xb4   :  { %v341_v47 = vpop.permute.xlu1 %340   ;;  %v332_v48 = vpop.permute.xlu0 %331  }
  0xb5   :  { %344 = vst.msk [vmem:[#allocation0 + $0x45] ss:$8 sm:$0xf] %vm4_vm0, %v341_v47   ;;  %346 = vst.msk [vmem:[#allocation0 + $0x45] ss:$8 sm:$0xf0] %vm4_vm0, %v341_v47  }
  0xb6   :  { %335 = vst.msk [vmem:[#allocation0 + $0x5] ss:$8 sm:$0xf] %vm4_vm0, %v332_v48   ;;  %337 = vst.msk [vmem:[#allocation0 + $0x5] ss:$8 sm:$0xf0] %vm4_vm0, %v332_v48  }
  0xb8   :  { %v359_v49 = vpop.permute.xlu1 %358   ;;  %v350_v50 = vpop.permute.xlu0 %349  }
  0xb9   :  { %362 = vst.msk [vmem:[#allocation0 + $0xc5] ss:$8 sm:$0xf] %vm4_vm0, %v359_v49   ;;  %364 = vst.msk [vmem:[#allocation0 + $0xc5] ss:$8 sm:$0xf0] %vm4_vm0, %v359_v49  }
  0xba   :  { %353 = vst.msk [vmem:[#allocation0 + $0x85] ss:$8 sm:$0xf] %vm4_vm0, %v350_v50   ;;  %355 = vst.msk [vmem:[#allocation0 + $0x85] ss:$8 sm:$0xf0] %vm4_vm0, %v350_v50  }
  0xbc   :  { %v377_v51 = vpop.permute.xlu1 %376   ;;  %v368_v52 = vpop.permute.xlu0 %367  }
  0xbd   :  { %380 = vst.msk [vmem:[#allocation0 + $0x145] ss:$8 sm:$0xf] %vm4_vm0, %v377_v51   ;;  %382 = vst.msk [vmem:[#allocation0 + $0x145] ss:$8 sm:$0xf0] %vm4_vm0, %v377_v51  }
  0xbe   :  { %371 = vst.msk [vmem:[#allocation0 + $0x105] ss:$8 sm:$0xf] %vm4_vm0, %v368_v52   ;;  %373 = vst.msk [vmem:[#allocation0 + $0x105] ss:$8 sm:$0xf0] %vm4_vm0, %v368_v52  }
  0xc0   :  { %v395_v53 = vpop.permute.xlu1 %394   ;;  %v386_v54 = vpop.permute.xlu0 %385  }
  0xc1   :  { %398 = vst.msk [vmem:[#allocation0 + $0x1c5] ss:$8 sm:$0xf] %vm4_vm0, %v395_v53   ;;  %389 = vst.msk [vmem:[#allocation0 + $0x185] ss:$8 sm:$0xf] %vm4_vm0, %v386_v54  }
  0xc2   :  { %391 = vst.msk [vmem:[#allocation0 + $0x185] ss:$8 sm:$0xf0] %vm4_vm0, %v386_v54  }
  0xc4   :  { %v410_v55 = vpop.permute.xlu1 %409   ;;  %v401_v56 = vpop.permute.xlu0 %400  }
  0xc5   :  { %413 = vst.msk [vmem:[#allocation0 + $0x46] ss:$8 sm:$0xf] %vm4_vm0, %v410_v55   ;;  %415 = vst.msk [vmem:[#allocation0 + $0x46] ss:$8 sm:$0xf0] %vm4_vm0, %v410_v55  }
  0xc6   :  { %404 = vst.msk [vmem:[#allocation0 + $0x6] ss:$8 sm:$0xf] %vm4_vm0, %v401_v56   ;;  %406 = vst.msk [vmem:[#allocation0 + $0x6] ss:$8 sm:$0xf0] %vm4_vm0, %v401_v56  }
  0xc8   :  { %v428_v57 = vpop.permute.xlu1 %427   ;;  %v419_v58 = vpop.permute.xlu0 %418  }
  0xc9   :  { %431 = vst.msk [vmem:[#allocation0 + $0xc6] ss:$8 sm:$0xf] %vm4_vm0, %v428_v57   ;;  %433 = vst.msk [vmem:[#allocation0 + $0xc6] ss:$8 sm:$0xf0] %vm4_vm0, %v428_v57  }
  0xca   :  { %422 = vst.msk [vmem:[#allocation0 + $0x86] ss:$8 sm:$0xf] %vm4_vm0, %v419_v58   ;;  %424 = vst.msk [vmem:[#allocation0 + $0x86] ss:$8 sm:$0xf0] %vm4_vm0, %v419_v58  }
  0xcc   :  { %v446_v59 = vpop.permute.xlu1 %445   ;;  %v437_v60 = vpop.permute.xlu0 %436  }
  0xcd   :  { %449 = vst.msk [vmem:[#allocation0 + $0x146] ss:$8 sm:$0xf] %vm4_vm0, %v446_v59   ;;  %451 = vst.msk [vmem:[#allocation0 + $0x146] ss:$8 sm:$0xf0] %vm4_vm0, %v446_v59  }
  0xce   :  { %440 = vst.msk [vmem:[#allocation0 + $0x106] ss:$8 sm:$0xf] %vm4_vm0, %v437_v60   ;;  %442 = vst.msk [vmem:[#allocation0 + $0x106] ss:$8 sm:$0xf0] %vm4_vm0, %v437_v60  }
  0xd0   :  { %v464_v61 = vpop.permute.xlu1 %463   ;;  %v455_v62 = vpop.permute.xlu0 %454  }
  0xd1   :  { %467 = vst.msk [vmem:[#allocation0 + $0x1c6] ss:$8 sm:$0xf] %vm4_vm0, %v464_v61   ;;  %458 = vst.msk [vmem:[#allocation0 + $0x186] ss:$8 sm:$0xf] %vm4_vm0, %v455_v62  }
  0xd2   :  { %460 = vst.msk [vmem:[#allocation0 + $0x186] ss:$8 sm:$0xf0] %vm4_vm0, %v455_v62  }
  0xd4   :  { %v479_v63 = vpop.permute.xlu1 %478   ;;  %v470_v0 = vpop.permute.xlu0 %469  }
  0xd5   :  { %482 = vst.msk [vmem:[#allocation0 + $0x47] ss:$8 sm:$0xf] %vm4_vm0, %v479_v63   ;;  %484 = vst.msk [vmem:[#allocation0 + $0x47] ss:$8 sm:$0xf0] %vm4_vm0, %v479_v63  }
  0xd6   :  { %473 = vst.msk [vmem:[#allocation0 + $0x7] ss:$8 sm:$0xf] %vm4_vm0, %v470_v0   ;;  %475 = vst.msk [vmem:[#allocation0 + $0x7] ss:$8 sm:$0xf0] %vm4_vm0, %v470_v0  }
  0xd8   :  { %v497_v1 = vpop.permute.xlu1 %496   ;;  %v488_v2 = vpop.permute.xlu0 %487  }
  0xd9   :  { %500 = vst.msk [vmem:[#allocation0 + $0xc7] ss:$8 sm:$0xf] %vm4_vm0, %v497_v1   ;;  %502 = vst.msk [vmem:[#allocation0 + $0xc7] ss:$8 sm:$0xf0] %vm4_vm0, %v497_v1  }
  0xda   :  { %491 = vst.msk [vmem:[#allocation0 + $0x87] ss:$8 sm:$0xf] %vm4_vm0, %v488_v2   ;;  %493 = vst.msk [vmem:[#allocation0 + $0x87] ss:$8 sm:$0xf0] %vm4_vm0, %v488_v2  }
  0xdc   :  { %v515_v3 = vpop.permute.xlu1 %514   ;;  %v506_v4 = vpop.permute.xlu0 %505  }
  0xdd   :  { %518 = vst.msk [vmem:[#allocation0 + $0x147] ss:$8 sm:$0xf] %vm4_vm0, %v515_v3   ;;  %520 = vst.msk [vmem:[#allocation0 + $0x147] ss:$8 sm:$0xf0] %vm4_vm0, %v515_v3  }
  0xde   :  { %509 = vst.msk [vmem:[#allocation0 + $0x107] ss:$8 sm:$0xf] %vm4_vm0, %v506_v4   ;;  %511 = vst.msk [vmem:[#allocation0 + $0x107] ss:$8 sm:$0xf0] %vm4_vm0, %v506_v4  }
  0xe0   :  { %v533_v5 = vpop.permute.xlu1 %532   ;;  %v524_v6 = vpop.permute.xlu0 %523  }
  0xe1   :  { %536 = vst.msk [vmem:[#allocation0 + $0x1c7] ss:$8 sm:$0xf] %vm4_vm0, %v533_v5   ;;  %527 = vst.msk [vmem:[#allocation0 + $0x187] ss:$8 sm:$0xf] %vm4_vm0, %v524_v6  }
  0xe2   :  { %529 = vst.msk [vmem:[#allocation0 + $0x187] ss:$8 sm:$0xf0] %vm4_vm0, %v524_v6  }
  0xe3   :  { %622 = shalt.err (!%p619_p4)
}
  0xe4   :  { %s623_s18 = scalar_lea.hbm %s908_s1, 7680 }
  0xe5   :  { %p624_p5 = scmp.ne.s32.totalorder %s908_s1, %s623_s18  ;;  %p627_p6 = scmp.lt.u32.totalorder %s623_s18, %s908_s1 }
  0xe7   :  { %p629_p7 = pnand %p627_p6, %p624_p5 }
  0xe9   :  { %632 = shalt.err (!%p629_p7)
}
  0xea   :  { %544 = dma.vmem_to_hbm [thread:$0]  %s542_s14, 7680, %s908_s1, [#allocation1]  }
  0xeb   :  { %633 = dma.done.wait [#allocation1], 7680  }
  0xec   :  { %634 = vsyncadd [#allocation1], 4294959616 }
  0xed   :  { %546 = vsyncpa [#allocation1], 1 }

</bundles_post_ra>
